<compile_context>
chip_gen: v7x
topology: tpu7x:2x2x1
jax: 0.10.0
libtpu: 0.0.40
codegen_flags: <defaults>
</compile_context>

<pallas_src>
import jax
import jax.numpy as jnp
from jax import lax
from jax.experimental import pallas as pl
from jax.experimental.pallas import tpu as pltpu

BN_EPS = 1e-5  # nn.BatchNorm1d default


# --------------------------------------------------------------------------------------
# small helpers
# --------------------------------------------------------------------------------------
def _ceil_to(v, m):
    return ((v + m - 1) // m) * m


def _padded_vmem_bytes(shape, dtype):
    """Bytes of one array once padded to the (8, 128) VMEM tile."""
    shape = tuple(int(d) for d in shape)
    if len(shape) == 1:
        shape = (1,) + shape
    lead = 1
    for d in shape[:-2]:
        lead *= d
    rows = _ceil_to(shape[-2], 8)
    cols = _ceil_to(shape[-1], 128)
    return lead * rows * cols * jnp.dtype(dtype).itemsize


def _vmem_budget(tiled, resident):
    """VMEM limit: 2x (double-buffered) tiled blocks + resident blocks + headroom,
    capped below v7x's 64 MiB physical ceiling."""
    est = sum(2 * _padded_vmem_bytes(s, d) for s, d in tiled)
    est += sum(_padded_vmem_bytes(s, d) for s, d in resident)
    est += 4 << 20  # compiler-internal scratch headroom
    return int(min(max(est, 16 << 20), 48 << 20))


# --------------------------------------------------------------------------------------
# kernels
# --------------------------------------------------------------------------------------
def bn_stats_kernel(x_ref, w1_ref, stats_ref):
    """Pass 1: Linear1 (bias elided) + one-pass per-feature sum / sum-of-squares.

    stats_ref is a (2, Hp) accumulator resident across the N-tile grid axis.
    Zero-padded batch rows contribute exactly 0 to both sums.
    """
    @pl.when(pl.program_id(0) == 0)
    def _():
        stats_ref[...] = jnp.zeros_like(stats_ref)

    # bf16 operands, f32 accumulation on the MXU.
    h = jnp.dot(x_ref[...], w1_ref[...], preferred_element_type=jnp.float32)
    h_sum = jnp.sum(h, axis=0, keepdims=True)        # (1, Hp)
    hh_sum = jnp.sum(h * h, axis=0, keepdims=True)   # (1, Hp)  (no centered temp)
    stats_ref[...] += jnp.concatenate([h_sum, hh_sum], axis=0)


def bn_apply_kernel(x_ref, w1_ref, affine_ref, w2_ref, o_ref):
    """Pass 2: Linear1 -> folded BN affine -> ReLU -> Linear2 (bias=False), per N-tile."""
    h = jnp.dot(x_ref[...], w1_ref[...], preferred_element_type=jnp.float32)
    # affine_ref holds the pre-folded (scale, shift) rows: one fused pass over (tile, Hp).
    h_act = jnp.maximum(h * affine_ref[0:1, :] + affine_ref[1:2, :], 0.0)
    o_ref[...] = jnp.dot(
        h_act.astype(w2_ref.dtype), w2_ref[...], preferred_element_type=jnp.float32
    ).astype(o_ref.dtype)


# --------------------------------------------------------------------------------------
# module wrapper (parameters padded / packed / cast ONCE here)
# --------------------------------------------------------------------------------------
def make_projection_head(w1, b1, gamma, beta, w2, *, lane_multiple=128, max_tile_n=256):
    """Builds the forward pass of ProjectionHead.

    w1: (D_in, H), b1/gamma/beta: (H,) or (1, H), w2: (H, D_out)
    (weights stored pre-transposed vs. PyTorch so matmuls are plain `x @ w`).

    lane_multiple: 128 is correct on all generations (v5e MXU is 4x128^2); use 256 on
    v6e/v7x for large H/D_out to keep the 2x256^2 MXU full.
    """
    del b1  # Linear1 bias cancels exactly in train-mode BatchNorm (h - mean)

    D_in, H = w1.shape
    D_out = w2.shape[1]
    Hp = _ceil_to(H, lane_multiple)
    Dp = _ceil_to(D_out, lane_multiple)

    gamma = jnp.reshape(gamma, (1, H)).astype(jnp.float32)
    beta = jnp.reshape(beta, (1, H)).astype(jnp.float32)

    # Padding invariants: padded hidden channels have mean = var = 0; with beta_pad = 0
    # they come out of BN+ReLU as exactly 0 and feed zero rows of w2, so the sliced
    # output is unchanged.  (gamma_pad value is irrelevant but kept at 1.0.)
    w1p = jnp.pad(w1, ((0, 0), (0, Hp - H))).astype(jnp.bfloat16)
    w2p = jnp.pad(w2, ((0, Hp - H), (0, Dp - D_out))).astype(jnp.bfloat16)
    gamma_p = jnp.pad(gamma, ((0, 0), (0, Hp - H)), constant_values=1.0)
    beta_p = jnp.pad(beta, ((0, 0), (0, Hp - H)))  # zeros

    def apply(x):
        N, d = x.shape
        assert d == D_in, "input feature dim mismatch"

        # bf16 sublane alignment on the batch axis (multiples of 16); padded rows are
        # zeros and contribute 0 to the batch statistics (we divide by the real N).
        tile_n = min(max_tile_n, _ceil_to(N, 16))
        Np = _ceil_to(N, tile_n)
        nt = Np // tile_n
        xb = x.astype(jnp.bfloat16)
        if Np != N:
            xb = jnp.pad(xb, ((0, Np - N), (0, 0)))

        # ---------------- pass 1: batch statistics (reduction over N-tiles) -----------
        stats = pl.pallas_call(
            bn_stats_kernel,
            out_shape=jax.ShapeDtypeStruct((2, Hp), jnp.float32),
            grid_spec=pltpu.PrefetchScalarGridSpec(
                num_scalar_prefetch=0,
                grid=(nt,),
                in_specs=[
                    pl.BlockSpec((tile_n, D_in), lambda i: (i, 0)),
                    pl.BlockSpec((D_in, Hp), lambda i: (0, 0)),
                ],
                out_specs=pl.BlockSpec((2, Hp), lambda i: (0, 0)),
            ),
            compiler_params=pltpu.CompilerParams(
                dimension_semantics=("arbitrary",),  # accumulator across N-tiles
                vmem_limit_bytes=_vmem_budget(
                    tiled=[((tile_n, D_in), jnp.bfloat16)],
                    resident=[((D_in, Hp), jnp.bfloat16), ((2, Hp), jnp.float32)],
                ),
            ),
        )(xb, w1p)

        # ---- fold BN into one per-feature (scale, shift) row: computed ONCE, tiny ----
        inv_n = 1.0 / N
        mean = stats[0:1, :] * inv_n
        var = jnp.maximum(stats[1:2, :] * inv_n - mean * mean, 0.0)  # one-pass variance
        scale = gamma_p * lax.rsqrt(var + BN_EPS)
        shift = beta_p - mean * scale
        affine = jnp.concatenate([scale, shift], axis=0)  # (2, Hp), one small DMA

        # ---------------- pass 2: apply (independent per N-tile -> "parallel") --------
        out_padded = pl.pallas_call(
            bn_apply_kernel,
            out_shape=jax.ShapeDtypeStruct((Np, Dp), jnp.float32),
            grid_spec=pltpu.PrefetchScalarGridSpec(
                num_scalar_prefetch=0,
                grid=(nt,),
                in_specs=[
                    pl.BlockSpec((tile_n, D_in), lambda i: (i, 0)),
                    pl.BlockSpec((D_in, Hp), lambda i: (0, 0)),
                    pl.BlockSpec((2, Hp), lambda i: (0, 0)),
                    pl.BlockSpec((Hp, Dp), lambda i: (0, 0)),
                ],
                out_specs=pl.BlockSpec((tile_n, Dp), lambda i: (i, 0)),
            ),
            compiler_params=pltpu.CompilerParams(
                dimension_semantics=("parallel",),  # both TensorCores on v7x
                vmem_limit_bytes=_vmem_budget(
                    tiled=[((tile_n, D_in), jnp.bfloat16), ((tile_n, Dp), jnp.float32)],
                    resident=[
                        ((D_in, Hp), jnp.bfloat16),
                        ((2, Hp), jnp.float32),
                        ((Hp, Dp), jnp.bfloat16),
                    ],
                ),
            ),
        )(xb, w1p, affine, w2p)

        return out_padded[:N, :D_out]

    return jax.jit(apply)


# --------------------------------------------------------------------------------------
# pure-JAX reference with exact PyTorch-module semantics (f32, bias included)
# --------------------------------------------------------------------------------------
def reference(x, w1, b1, gamma, beta, w2):
    h = x @ w1 + b1
    mean = jnp.mean(h, axis=0, keepdims=True)
    var = jnp.mean((h - mean) ** 2, axis=0, keepdims=True)
    h = (h - mean) / jnp.sqrt(var + BN_EPS)
    h = h * jnp.reshape(gamma, (1, -1)) + jnp.reshape(beta, (1, -1))
    h = jnp.maximum(h, 0.0)
    return h @ w2


if __name__ == "__main__":
    # Small shapes consistent with the module's forward (x: (batch, input_dim)).
    batch, input_dim, hidden_dim, output_dim = 8, 32, 64, 16

    key = jax.random.PRNGKey(0)
    k_x, k_w1, k_b1, k_w2 = jax.random.split(key, 4)

    x = jax.random.normal(k_x, (batch, input_dim), dtype=jnp.float32)
    w1 = jax.random.normal(k_w1, (input_dim, hidden_dim), dtype=jnp.float32) * 0.05
    b1 = jax.random.normal(k_b1, (1, hidden_dim), dtype=jnp.float32) * 0.05
    gamma = jnp.ones((1, hidden_dim), dtype=jnp.float32)   # BatchNorm1d default weight
    beta = jnp.zeros((1, hidden_dim), dtype=jnp.float32)   # BatchNorm1d default bias
    w2 = jax.random.normal(k_w2, (hidden_dim, output_dim), dtype=jnp.float32) * 0.05

    head = make_projection_head(w1, b1, gamma, beta, w2)
    out = head(x)
    out = jax.block_until_ready(out)

    ref = reference(x, w1, b1, gamma, beta, w2)
    assert out.shape == (batch, output_dim)
    # bf16 MXU matmuls with f32 accumulation -> relaxed tolerance vs. the f32 reference.
    assert jnp.allclose(out, ref, atol=2e-2, rtol=2e-2), "mismatch vs reference"

    print("KERNEL_OK")
</pallas_src>

<mosaic_0001>
module attributes {stable_mosaic.version = 11 : i64} {
  func.func @bn_stats_kernel(%arg0: i32, %arg1: memref<16x32xbf16, #tpu.memory_space<vmem>>, %arg2: memref<32x128xbf16, #tpu.memory_space<vmem>>, %arg3: memref<2x128xf32, #tpu.memory_space<vmem>>) attributes {dimension_semantics = [#tpu.dimension_semantics<arbitrary>], iteration_bounds = array<i64: 1>, scalar_prefetch = 0 : i64, scratch_operands = 0 : i64, tpu.core_type = #tpu.core_type<tc>, window_params = [{transform_indices = @transform_0, window_bounds = array<i64: 16, 32>}, {pipeline_mode = #tpu.pipeline_mode<synchronous>, transform_indices = @transform_1, window_bounds = array<i64: 32, 128>}, {pipeline_mode = #tpu.pipeline_mode<synchronous>, transform_indices = @transform_2, window_bounds = array<i64: 2, 128>}]} {
    %c0_i32 = arith.constant 0 : i32
    %0 = arith.cmpi eq, %arg0, %c0_i32 : i32
    %1 = arith.extui %0 : i1 to i32
    %c0_i32_0 = arith.constant 0 : i32
    %2 = arith.cmpi ne, %1, %c0_i32_0 : i32
    scf.if %2 {
      %cst_10 = arith.constant 0.000000e+00 : f32
      %15 = vector.broadcast %cst_10 : f32 to vector<2x128xf32>
      %c0_11 = arith.constant 0 : index
      %c0_12 = arith.constant 0 : index
      %16 = vector.load %arg3[%c0_11, %c0_12] : memref<2x128xf32, #tpu.memory_space<vmem>>, vector<2x128xf32>
      tpu.vector_store %arg3[%c0_11, %c0_12], %15 {strides = array<i32>} : memref<2x128xf32, #tpu.memory_space<vmem>>, vector<2x128xf32>,
    } else {
    }
    %c0 = arith.constant 0 : index
    %c0_1 = arith.constant 0 : index
    %3 = vector.load %arg1[%c0, %c0_1] : memref<16x32xbf16, #tpu.memory_space<vmem>>, vector<16x32xbf16>
    %c0_2 = arith.constant 0 : index
    %c0_3 = arith.constant 0 : index
    %4 = vector.load %arg2[%c0_2, %c0_3] : memref<32x128xbf16, #tpu.memory_space<vmem>>, vector<32x128xbf16>
    %cst = arith.constant dense<0.000000e+00> : vector<16x128xf32>
    %5 = tpu.matmul %3, %4, %cst {dimension_numbers = #tpu.dot_dimension_numbers<[1], [0], [0], [1], [0, 0, 1, 1], [], []>} : vector<16x32xbf16>, vector<32x128xbf16>, vector<16x128xf32> -> vector<16x128xf32>
    %cst_4 = arith.constant dense<0.000000e+00> : vector<128xf32>
    %6 = vector.multi_reduction <add>, %5, %cst_4 [0] : vector<16x128xf32> to vector<128xf32>
    %7 = vector.shape_cast %6 : vector<128xf32> to vector<1x128xf32>
    %8 = arith.mulf %5, %5 : vector<16x128xf32>
    %cst_5 = arith.constant dense<0.000000e+00> : vector<128xf32>
    %9 = vector.multi_reduction <add>, %8, %cst_5 [0] : vector<16x128xf32> to vector<128xf32>
    %10 = vector.shape_cast %9 : vector<128xf32> to vector<1x128xf32>
    %c0_6 = arith.constant 0 : index
    %c0_7 = arith.constant 0 : index
    %11 = vector.load %arg3[%c0_6, %c0_7] : memref<2x128xf32, #tpu.memory_space<vmem>>, vector<2x128xf32>
    %12 = tpu.concatenate %7, %10 in 0 : vector<1x128xf32>, vector<1x128xf32> -> vector<2x128xf32>
    %13 = arith.addf %11, %12 : vector<2x128xf32>
    %c0_8 = arith.constant 0 : index
    %c0_9 = arith.constant 0 : index
    %14 = vector.load %arg3[%c0_8, %c0_9] : memref<2x128xf32, #tpu.memory_space<vmem>>, vector<2x128xf32>
    tpu.vector_store %arg3[%c0_8, %c0_9], %13 {strides = array<i32>} : memref<2x128xf32, #tpu.memory_space<vmem>>, vector<2x128xf32>,
    return
  }
  func.func @transform_0(%arg0: i32) -> (i32, i32) {
    %c0_i32 = arith.constant 0 : i32
    %c0_i32_0 = arith.constant 0 : i32
    return %arg0, %c0_i32 : i32, i32
  }
  func.func @transform_1(%arg0: i32) -> (i32, i32) {
    %c0_i32 = arith.constant 0 : i32
    %c0_i32_0 = arith.constant 0 : i32
    %c0_i32_1 = arith.constant 0 : i32
    return %c0_i32, %c0_i32_0 : i32, i32
  }
  func.func @transform_2(%arg0: i32) -> (i32, i32) {
    %c0_i32 = arith.constant 0 : i32
    %c0_i32_0 = arith.constant 0 : i32
    %c0_i32_1 = arith.constant 0 : i32
    return %c0_i32, %c0_i32_0 : i32, i32
  }
}

module attributes {stable_mosaic.version = 11 : i64} {
  func.func @bn_apply_kernel(%arg0: i32, %arg1: memref<16x32xbf16, #tpu.memory_space<vmem>>, %arg2: memref<32x128xbf16, #tpu.memory_space<vmem>>, %arg3: memref<2x128xf32, #tpu.memory_space<vmem>>, %arg4: memref<128x128xbf16, #tpu.memory_space<vmem>>, %arg5: memref<16x128xf32, #tpu.memory_space<vmem>>) attributes {dimension_semantics = [#tpu.dimension_semantics<parallel>], iteration_bounds = array<i64: 1>, scalar_prefetch = 0 : i64, scratch_operands = 0 : i64, tpu.core_type = #tpu.core_type<tc>, window_params = [{transform_indices = @transform_0, window_bounds = array<i64: 16, 32>}, {pipeline_mode = #tpu.pipeline_mode<synchronous>, transform_indices = @transform_1, window_bounds = array<i64: 32, 128>}, {pipeline_mode = #tpu.pipeline_mode<synchronous>, transform_indices = @transform_2, window_bounds = array<i64: 2, 128>}, {pipeline_mode = #tpu.pipeline_mode<synchronous>, transform_indices = @transform_3, window_bounds = array<i64: 128, 128>}, {transform_indices = @transform_4, window_bounds = array<i64: 16, 128>}]} {
    %c0 = arith.constant 0 : index
    %c0_0 = arith.constant 0 : index
    %0 = vector.load %arg1[%c0, %c0_0] : memref<16x32xbf16, #tpu.memory_space<vmem>>, vector<16x32xbf16>
    %c0_1 = arith.constant 0 : index
    %c0_2 = arith.constant 0 : index
    %1 = vector.load %arg2[%c0_1, %c0_2] : memref<32x128xbf16, #tpu.memory_space<vmem>>, vector<32x128xbf16>
    %cst = arith.constant dense<0.000000e+00> : vector<16x128xf32>
    %2 = tpu.matmul %0, %1, %cst {dimension_numbers = #tpu.dot_dimension_numbers<[1], [0], [0], [1], [0, 0, 1, 1], [], []>} : vector<16x32xbf16>, vector<32x128xbf16>, vector<16x128xf32> -> vector<16x128xf32>
    %c0_3 = arith.constant 0 : index
    %c0_4 = arith.constant 0 : index
    %3 = vector.load %arg3[%c0_3, %c0_4] : memref<2x128xf32, #tpu.memory_space<vmem>>, vector<1x128xf32>
    %4 = vector.broadcast %3 : vector<1x128xf32> to vector<16x128xf32>
    %5 = arith.mulf %2, %4 : vector<16x128xf32>
    %c1 = arith.constant 1 : index
    %c0_5 = arith.constant 0 : index
    %6 = vector.load %arg3[%c1, %c0_5] : memref<2x128xf32, #tpu.memory_space<vmem>>, vector<1x128xf32>
    %7 = vector.broadcast %6 : vector<1x128xf32> to vector<16x128xf32>
    %8 = arith.addf %5, %7 : vector<16x128xf32>
    %cst_6 = arith.constant 0.000000e+00 : f32
    %9 = vector.broadcast %cst_6 : f32 to vector<16x128xf32>
    %10 = arith.maximumf %8, %9 : vector<16x128xf32>
    %11 = arith.truncf %10 : vector<16x128xf32> to vector<16x128xbf16>
    %c0_7 = arith.constant 0 : index
    %c0_8 = arith.constant 0 : index
    %12 = vector.load %arg4[%c0_7, %c0_8] : memref<128x128xbf16, #tpu.memory_space<vmem>>, vector<128x128xbf16>
    %cst_9 = arith.constant dense<0.000000e+00> : vector<16x128xf32>
    %13 = tpu.matmul %11, %12, %cst_9 {dimension_numbers = #tpu.dot_dimension_numbers<[1], [0], [0], [1], [0, 0, 1, 1], [], []>} : vector<16x128xbf16>, vector<128x128xbf16>, vector<16x128xf32> -> vector<16x128xf32>
    %c0_10 = arith.constant 0 : index
    %c0_11 = arith.constant 0 : index
    %14 = vector.load %arg5[%c0_10, %c0_11] : memref<16x128xf32, #tpu.memory_space<vmem>>, vector<16x128xf32>
    tpu.vector_store %arg5[%c0_10, %c0_11], %13 {strides = array<i32>} : memref<16x128xf32, #tpu.memory_space<vmem>>, vector<16x128xf32>,
    return
  }
  func.func @transform_0(%arg0: i32) -> (i32, i32) {
    %c0_i32 = arith.constant 0 : i32
    %c0_i32_0 = arith.constant 0 : i32
    return %arg0, %c0_i32 : i32, i32
  }
  func.func @transform_1(%arg0: i32) -> (i32, i32) {
    %c0_i32 = arith.constant 0 : i32
    %c0_i32_0 = arith.constant 0 : i32
    %c0_i32_1 = arith.constant 0 : i32
    return %c0_i32, %c0_i32_0 : i32, i32
  }
  func.func @transform_2(%arg0: i32) -> (i32, i32) {
    %c0_i32 = arith.constant 0 : i32
    %c0_i32_0 = arith.constant 0 : i32
    %c0_i32_1 = arith.constant 0 : i32
    return %c0_i32, %c0_i32_0 : i32, i32
  }
  func.func @transform_3(%arg0: i32) -> (i32, i32) {
    %c0_i32 = arith.constant 0 : i32
    %c0_i32_0 = arith.constant 0 : i32
    %c0_i32_1 = arith.constant 0 : i32
    return %c0_i32, %c0_i32_0 : i32, i32
  }
  func.func @transform_4(%arg0: i32) -> (i32, i32) {
    %c0_i32 = arith.constant 0 : i32
    %c0_i32_0 = arith.constant 0 : i32
    return %arg0, %c0_i32 : i32, i32
  }
}

</mosaic_0001>

<bundles_post_ra>
// kernel: apply.2
= control target key start
LH: loop header
LB: loop body
LE: loop exit
PB: predicated region body
PF: predicated region fallthrough
CT: control target
= control target key end

     0   :  { %v130_v0 = vmov 0.0   ;;  %vm131_vm0 = vmmov 0   ;;  %vm40_vm1 = vcmask 261120   ;;  %vm102_vm2 = vcmask 1040384   ;;  %s165_s2 = inlined_call_operand.vmem [shape: f32[2,128], index: 2, kind: output, shape index: {}]   ;;  %s166_s1 = inlined_call_operand.vmem [shape: bf16[32,128], index: 1, kind: input, shape index: {}]   ;;  %s167_s0 = inlined_call_operand.vmem [shape: bf16[16,32], index: 0, kind: input, shape index: {}]  }
   0x1   :  { %16 = vst [vmem:[%s165_s2] sm:$0x3] %v130_v0  ;;  %117 = vmatprep.subr.bf16.mxu0 %v130_v0  ;;  %v127_v1 = vld [vmem:[%s166_s1] sm:$0xff]   ;;  %121 = vmatprep.mubr.msk.bf16.mxu0 %vm131_vm0, %v130_v0  ;;  %v128_v2 = vld [vmem:[%s166_s1 + $0x8] sm:$0xff]  }
   0x2   :  { %118 = vmatpush3.bf16.msra.mxu0 %v127_v1  ;;  %v129_v3 = vld [vmem:[%s167_s0] sm:$0xff]  }
   0x3   :  { %119 = vmatprep.subr.bf16.mxu0 %v130_v0 }
   0x6   :  { %120 = vmatpush3.bf16.msra.mxu0 %v128_v2 }
   0x8   :  { %v101_v22 = vld [vmem:[%s165_s2] sm:$0x3] }
   0x9   :  { %122 = vmatmul.mubr.msk.bf16.vlgmr.msra.gmra.mrb[0].mxu0 %vm40_vm1, %v129_v3 }
  0xdc   :  { %v78_v4 = vpop.f32.mrb[0].mxu0 }
  0xdd   :  { %v123_v5 = vpop.f32.mrb[1].mxu0  ;;  %v92_v7 = vmul.f32 %v78_v4, %v78_v4 }
  0xde   :  { %v81_v6 = vpop.f32.mrb[2].mxu0 }
  0xdf   :  { %v85_v8 = vadd.f32 %v81_v6, %v78_v4  ;;  %v93_v9 = vmul.f32 %v81_v6, %v81_v6  ;;  %v124_v10 = vpop.f32.mrb[3].mxu0 }
  0xe1   :  { %v86_v11 = vrot.slane %v85_v8, 4  ;;  %v94_v12 = vadd.f32 %v93_v9, %v92_v7 }
  0xe3   :  { %v87_v13 = vadd.f32 %v86_v11, %v85_v8  ;;  %v95_v14 = vrot.slane %v94_v12, 4 }
  0xe5   :  { %v88_v15 = vrot.slane %v87_v13, 2  ;;  %v96_v16 = vadd.f32 %v95_v14, %v94_v12 }
  0xe7   :  { %v89_v17 = vadd.f32 %v88_v15, %v87_v13  ;;  %v97_v18 = vrot.slane %v96_v16, 2 }
  0xe9   :  { %v90_v19 = vrot.slane %v89_v17, 1  ;;  %v98_v20 = vadd.f32 %v97_v18, %v96_v16 }
  0xeb   :  { %v99_v21 = vrot.slane %v98_v20, 1  ;;  %v91_v23 = vadd.f32 %v90_v19, %v89_v17 }
  0xed   :  { %v100_v24 = vadd.f32 %v99_v21, %v98_v20 }
  0xef   :  { %v103_v25 = vsel %vm102_vm2, %v91_v23, %v100_v24 }
  0xf0   :  { %v104_v26 = vadd.f32 %v103_v25, %v101_v22 }
  0xf2   :  { %105 = vst [vmem:[%s165_s2] sm:$0x3] %v104_v26 }

// kernel: apply.3
= control target key start
LH: loop header
LB: loop body
LE: loop exit
PB: predicated region body
PF: predicated region fallthrough
CT: control target
= control target key end

     0   :  { %v281_v0 = vmov 0.0   ;;  %vm282_vm0 = vmmov 0   ;;  %vm41_vm1 = vcmask 261120   ;;  %s353_s1 = inlined_call_operand.vmem [shape: bf16[32,128], index: 1, kind: input, shape index: {}]   ;;  %s354_s3 = inlined_call_operand.vmem [shape: bf16[128,128], index: 3, kind: input, shape index: {}]   ;;  %s355_s0 = inlined_call_operand.vmem [shape: bf16[16,32], index: 0, kind: input, shape index: {}]   ;;  %s356_s2 = inlined_call_operand.vmem [shape: f32[2,128], index: 2, kind: input, shape index: {}]   ;;  %s357_s4 = inlined_call_operand.vmem [shape: f32[16,128], index: 4, kind: output, shape index: {}]  }
   0x1   :  { %240 = vmatprep.subr.bf16.mxu0 %v281_v0  ;;  %v270_v1 = vld [vmem:[%s353_s1] sm:$0xff]   ;;  %244 = vmatprep.mubr.msk.bf16.mxu0 %vm282_vm0, %v281_v0  ;;  %v271_v2 = vld [vmem:[%s353_s1 + $0x8] sm:$0xff]   ;;  %v275_v6 = vld [vmem:[%s354_s3 + $0x10] sm:$0xff]  }
   0x2   :  { %248 = vmatprep.subr.bf16.mxu1 %v281_v0  ;;  %264 = vmatprep.mubr.msk.bf16.mxu1 %vm282_vm0, %v281_v0  ;;  %v273_v3 = vld [vmem:[%s354_s3] sm:$0xff]   ;;  %v274_v5 = vld [vmem:[%s354_s3 + $0x8] sm:$0xff]   ;;  %v276_v7 = vld [vmem:[%s354_s3 + $0x18] sm:$0xff]  }
   0x3   :  { %241 = vmatpush3.bf16.msra.mxu0 %v270_v1  ;;  %v272_v4 = vld [vmem:[%s355_s0] sm:$0xff]   ;;  %249 = vmatpush3.bf16.msra.mxu1 %v273_v3  ;;  %v278_v9 = vld [vmem:[%s354_s3 + $0x28] sm:$0xff]   ;;  %v279_v10 = vld [vmem:[%s354_s3 + $0x30] sm:$0xff]  }
   0x4   :  { %242 = vmatprep.subr.bf16.mxu0 %v281_v0  ;;  %250 = vmatprep.subr.bf16.mxu1 %v281_v0  ;;  %v277_v8 = vld [vmem:[%s354_s3 + $0x20] sm:$0xff]   ;;  %v280_v11 = vld [vmem:[%s354_s3 + $0x38] sm:$0xff]  }
   0x5   :  { %v218_v12 = vld [vmem:[%s356_s2] ss:$0 sm:$0xff]  ;;  %v219_v14 = vld [vmem:[%s356_s2 + $0x1] ss:$0 sm:$0xff] }
   0x7   :  { %243 = vmatpush3.bf16.msra.mxu0 %v271_v2  ;;  %251 = vmatpush3.bf16.msra.mxu1 %v274_v5 }
   0x8   :  { %252 = vmatprep.subr.bf16.mxu1 %v281_v0 }
   0xa   :  { %245 = vmatmul.mubr.msk.bf16.vlgmr.msra.gmra.mrb[0].mxu0 %vm41_vm1, %v272_v4 }
   0xb   :  { %253 = vmatpush3.bf16.msra.mxu1 %v275_v6 }
   0xc   :  { %254 = vmatprep.subr.bf16.mxu1 %v281_v0 }
   0xf   :  { %255 = vmatpush3.bf16.msra.mxu1 %v276_v7 }
  0x10   :  { %256 = vmatprep.subr.bf16.mxu1 %v281_v0 }
  0x13   :  { %257 = vmatpush3.bf16.msra.mxu1 %v277_v8 }
  0x14   :  { %258 = vmatprep.subr.bf16.mxu1 %v281_v0 }
  0x17   :  { %259 = vmatpush3.bf16.msra.mxu1 %v278_v9 }
  0x18   :  { %260 = vmatprep.subr.bf16.mxu1 %v281_v0 }
  0x1b   :  { %261 = vmatpush3.bf16.msra.mxu1 %v279_v10 }
  0x1c   :  { %262 = vmatprep.subr.bf16.mxu1 %v281_v0 }
  0x1f   :  { %263 = vmatpush3.bf16.msra.mxu1 %v280_v11 }
  0xdd   :  { %v79_v13 = vpop.f32.mrb[0].mxu0 }
  0xde   :  { %v91_v15 = vmul.f32 %v218_v12, %v79_v13  ;;  %v246_v16 = vpop.f32.mrb[1].mxu0 }
  0xdf   :  { %v82_v17 = vpop.f32.mrb[2].mxu0 }
  0xe0   :  { %v98_v18 = vadd.f32 %v219_v14, %v91_v15  ;;  %v92_v19 = vmul.f32 %v218_v12, %v82_v17  ;;  %v247_v20 = vpop.f32.mrb[3].mxu0 }
  0xe2   :  { %v99_v21 = vadd.f32 %v219_v14, %v92_v19  ;;  %v100_v22 = vmax.f32 %v98_v18, 0.0 }
  0xe4   :  { %v101_v23 = vmax.f32 %v99_v21, 0.0 }
  0xe6   :  { %v102_v24 = vpack.c.bf16 %v101_v23, %v100_v22 }
  0xe8   :  { %265 = vmatmul.mubr.bf16.vlgmr.msra.gmra.mrb[0].mxu1 %v102_v24 }
 0x1bb   :  { %v201_v25 = vpop.f32.mrb[0].mxu1 }
 0x1bc   :  { %208 = vst [vmem:[%s357_s4] sm:$0xff] %v201_v25  ;;  %v266_v26 = vpop.f32.mrb[1].mxu1 }
 0x1bd   :  { %v204_v27 = vpop.f32.mrb[2].mxu1 }
 0x1be   :  { %209 = vst [vmem:[%s357_s4 + $0x8] sm:$0xff] %v204_v27  ;;  %v267_v28 = vpop.f32.mrb[3].mxu1 }

</bundles_post_ra>
